<compile_context>
chip_gen: v5e
topology: v5e:2x2
jax: 0.10.0
libtpu: 0.0.40
codegen_flags: <defaults>
</compile_context>

<pallas_src>
import functools

import jax
import jax.numpy as jnp
from jax import lax
from jax.experimental import pallas as pl
from jax.experimental.pallas import tpu as pltpu

_LANE = 128
_MAX_BLOCK_ROWS = 1024  # 1024 x 128 f32 = 512 KiB per double-buffered block


def _actq_eval_kernel(scale_ref, x_ref, out_ref, *, nbits):
    """Elementwise fake-quant only (inference path: no error reductions)."""
    s = scale_ref[0]
    inv_s = 1.0 / s                       # one scalar divide per grid step
    qmin = -(2.0 ** (nbits - 1))
    qmax = 2.0 ** (nbits - 1) - 1.0
    x = x_ref[...].astype(jnp.float32)
    u = x * inv_s                         # replaces per-element divide
    y = jnp.round(jnp.clip(u, qmin, qmax)) * s
    out_ref[...] = y.astype(out_ref.dtype)


def _actq_train_kernel(scale_ref, x_ref, out_ref, err_ref, *, nbits, l2,
                       block_rows, total_rows):
    """Fake-quant + per-block partial error sums at scale, scale/2, scale*2."""
    s = scale_ref[0]
    inv_s = 1.0 / s
    qmin = -(2.0 ** (nbits - 1))
    qmax = 2.0 ** (nbits - 1) - 1.0

    x = x_ref[...].astype(jnp.float32)

    if total_rows % block_rows != 0:
        # Ragged tail block: zero rows past the array end so they quantize to 0 and
        # contribute nothing to the error sums (out-of-bounds output writes are
        # discarded by Pallas anyway).
        row = lax.broadcasted_iota(jnp.int32, x.shape, 0)
        valid = pl.program_id(0) * block_rows + row < total_rows
        x = jnp.where(valid, x, 0.0)

    u = x * inv_s  # single per-element multiply replaces three divisions

    def fq(un, sc):
        # un is x/sc (already divided); returns round(clip(un)) * sc
        return jnp.round(jnp.clip(un, qmin, qmax)) * sc

    y = fq(u, s)
    out_ref[...] = y.astype(out_ref.dtype)

    err = (lambda d: d * d) if l2 else jnp.abs
    # Per-lane partial sums, one (3, 128) slab per grid block -> no cross-step
    # carry, so the grid axis stays "parallel" (megacore friendly). The final
    # lane/block reduction is cheap glue in the wrapper.
    err_ref[0:1, :] = jnp.sum(err(x - y), axis=0, keepdims=True)
    err_ref[1:2, :] = jnp.sum(err(x - fq(u * 2.0, s * 0.5)), axis=0, keepdims=True)
    err_ref[2:3, :] = jnp.sum(err(x - fq(u * 0.5, s * 2.0)), axis=0, keepdims=True)


def actq_quantize(x, scale, *, nbits, l2=True, compute_err=False, block_rows=None):
    """Fake-quantize x with the Pallas kernel.

    Returns (quantized_x, errs). errs is None when compute_err=False, otherwise a
    (3,) array [err(scale), err(scale/2), err(scale*2)] (ln_error with is_act=True).
    """
    orig_shape = x.shape
    orig_dtype = x.dtype
    total = x.size

    xf = jnp.ravel(x)
    rem = total % _LANE
    if rem:
        # Rare: flat size not a multiple of 128 lanes. Pad with zeros (they quantize
        # to 0 and contribute 0 error). Common activation sizes take the no-copy path.
        xf = jnp.pad(xf, (0, _LANE - rem))
    x2 = xf.reshape(-1, _LANE)
    rows = x2.shape[0]

    if block_rows is None:
        block_rows = rows if rows <= _MAX_BLOCK_ROWS else _MAX_BLOCK_ROWS
    assert block_rows == rows or block_rows % 8 == 0
    nb = pl.cdiv(rows, block_rows)

    scale_arr = jnp.reshape(scale, (1,)).astype(jnp.float32)

    x_spec = pl.BlockSpec((block_rows, _LANE), lambda i, sc: (i, 0))
    y_spec = pl.BlockSpec((block_rows, _LANE), lambda i, sc: (i, 0))

    if compute_err:
        kernel = functools.partial(_actq_train_kernel, nbits=nbits, l2=l2,
                                   block_rows=block_rows, total_rows=rows)
        out2, err = pl.pallas_call(
            kernel,
            out_shape=(
                jax.ShapeDtypeStruct((rows, _LANE), orig_dtype),
                jax.ShapeDtypeStruct((nb, 3, _LANE), jnp.float32),
            ),
            grid_spec=pltpu.PrefetchScalarGridSpec(
                num_scalar_prefetch=1,
                grid=(nb,),
                in_specs=[x_spec],
                out_specs=(
                    y_spec,
                    # leading dim squeezed: kernel sees a (3, 128) err block
                    pl.BlockSpec((None, 3, _LANE), lambda i, sc: (i, 0, 0)),
                ),
            ),
            compiler_params=pltpu.CompilerParams(
                dimension_semantics=("parallel",)),
        )(scale_arr, x2)
        errs = jnp.sum(err, axis=(0, 2)) / float(total)
    else:
        kernel = functools.partial(_actq_eval_kernel, nbits=nbits)
        out2 = pl.pallas_call(
            kernel,
            out_shape=jax.ShapeDtypeStruct((rows, _LANE), orig_dtype),
            grid_spec=pltpu.PrefetchScalarGridSpec(
                num_scalar_prefetch=1,
                grid=(nb,),
                in_specs=[x_spec],
                out_specs=y_spec,
            ),
            compiler_params=pltpu.CompilerParams(
                dimension_semantics=("parallel",)),
        )(scale_arr, x2)
        errs = None

    if rem:
        out = out2.reshape(-1)[:total].reshape(orig_shape)
    else:
        out = out2.reshape(orig_shape)
    return out, errs


class ActQ:
    """JAX/Pallas port of models/_modules/quantize.ActQ (default path only)."""

    def __init__(self, nbits=4, signed=False, l2=True, ema_decay=0.999):
        if nbits < 0:
            self.running_scale = None
            return
        self.signed = signed
        self.nbits = nbits if signed else nbits + 1
        self.l2 = l2
        self.ema_decay = ema_decay
        self.running_scale = jnp.float32(0.5)   # reset_running_stats()
        self.init_state = 0
        # TODO(synk): scale_bits>0 (scale truncation), expand/split output modes and
        # out_scale are not implemented; defaults in the reference module disable them.
        # TODO(synk): straight-through estimator backward (y.detach()+x_clip-x_clip.detach())
        # would need jax.custom_vjp around actq_quantize; only forward is implemented.

    def __call__(self, x, training=False):
        if self.running_scale is None:
            return x
        if training and self.init_state == 0:
            if self.signed:
                self.running_scale = jnp.max(x) / (2.0 ** (self.nbits - 1))
            else:
                self.running_scale = jnp.max(x) / (2.0 ** self.nbits)
            self.init_state = 1

        scale = self.running_scale
        output, errs = actq_quantize(x, scale, nbits=self.nbits, l2=self.l2,
                                     compute_err=training)

        if training:
            error, s_error, b_error = errs[0], errs[1], errs[2]
            a1 = error - s_error
            a2 = b_error - error
            g1 = a1 >= 0
            g2 = a2 > 0
            g3 = (a1 + a2) >= 0
            b = jnp.logical_or(jnp.logical_and(~g1, ~g2),
                               jnp.logical_and(g1, jnp.logical_and(~g2, ~g3)))
            s = jnp.logical_or(jnp.logical_and(g1, g2),
                               jnp.logical_and(g1, jnp.logical_and(~g2, g3)))
            d = self.ema_decay
            rs = jnp.where(b, scale * d + (1.0 - d) * scale * 2.0, scale)
            rs = jnp.where(s, scale * d + (1.0 - d) * scale / 2.0, rs)
            self.running_scale = rs

        return output


def _reference_forward(x, scale, nbits):
    """Pure-JAX reference mirroring the kernel math (multiply by 1/scale)."""
    qmin = -(2.0 ** (nbits - 1))
    qmax = 2.0 ** (nbits - 1) - 1.0
    inv = 1.0 / scale
    return jnp.round(jnp.clip(x.astype(jnp.float32) * inv, qmin, qmax)) * scale


def _reference_forward_div(x, scale, nbits):
    """Exact-division (PyTorch) formulation; may differ from the kernel by at most
    one quantization step at round-half boundaries."""
    qmin = -(2.0 ** (nbits - 1))
    qmax = 2.0 ** (nbits - 1) - 1.0
    return jnp.round(jnp.clip(x.astype(jnp.float32) / scale, qmin, qmax)) * scale


def _reference_errors(x, scale, nbits, l2=True):
    qmin = -(2.0 ** (nbits - 1))
    qmax = 2.0 ** (nbits - 1) - 1.0
    xf = x.astype(jnp.float32)
    u = xf * (1.0 / scale)

    def fq(un, sc):
        return jnp.round(jnp.clip(un, qmin, qmax)) * sc

    def err(d):
        return jnp.sum(d * d) if l2 else jnp.sum(jnp.abs(d))

    n = float(xf.size)
    return jnp.stack([err(xf - fq(u, scale)),
                      err(xf - fq(u * 2.0, scale * 0.5)),
                      err(xf - fq(u * 0.5, scale * 2.0))]) / n


if __name__ == "__main__":
    key = jax.random.PRNGKey(0)
    x = jax.random.uniform(key, (2, 4, 16, 16), dtype=jnp.float32)  # NCHW activations

    m = ActQ(nbits=4, signed=False)  # internal nbits = 5
    s0 = jnp.max(x) / (2.0 ** m.nbits)  # scale used during the training step

    # Training step: initializes running_scale from input.max() and does the EMA update.
    y_train = jax.block_until_ready(m(x, training=True))
    # Eval step with the (updated) running scale: error-free fast path.
    y_eval = jax.block_until_ready(m(x, training=False))

    assert y_eval.shape == x.shape and y_eval.dtype == x.dtype

    ref_eval = _reference_forward(x, m.running_scale, m.nbits)
    assert jnp.allclose(y_eval, ref_eval, atol=1e-5), "eval mismatch vs reference"

    ref_train = _reference_forward(x, s0, m.nbits)
    assert jnp.allclose(y_train, ref_train, atol=1e-5), "train mismatch vs reference"

    # Exact-division (PyTorch) formulation: identical up to at most one quant step.
    ref_div = _reference_forward_div(x, m.running_scale, m.nbits)
    assert float(jnp.max(jnp.abs(y_eval - ref_div))) <= float(m.running_scale) + 1e-5

    # Exercise the ragged-tail (masked) training path with a forced small block.
    x2 = jax.random.normal(jax.random.PRNGKey(1), (10, 128), dtype=jnp.float32)
    sc2 = jnp.float32(0.25)
    out2, errs2 = actq_quantize(x2, sc2, nbits=5, l2=True,
                                compute_err=True, block_rows=8)
    assert jnp.allclose(out2, _reference_forward(x2, sc2, 5), atol=1e-5)
    assert jnp.allclose(errs2, _reference_errors(x2, sc2, 5), rtol=1e-4, atol=1e-6)

    print("KERNEL_OK")
</pallas_src>

<mosaic_0001>
module attributes {stable_mosaic.version = 11 : i64} {
  func.func @_actq_train_kernel(%arg0: i32, %arg1: memref<1xf32, #tpu.memory_space<smem>>, %arg2: memref<16x128xf32, #tpu.memory_space<vmem>>, %arg3: memref<16x128xf32, #tpu.memory_space<vmem>>, %arg4: memref<1x3x128xf32, #tpu.memory_space<vmem>>) attributes {dimension_semantics = [#tpu.dimension_semantics<parallel>], iteration_bounds = array<i64: 1>, scalar_prefetch = 1 : i64, scratch_operands = 0 : i64, tpu.core_type = #tpu.core_type<tc>, window_params = [{transform_indices = @transform_0, window_bounds = array<i64: 16, 128>}, {transform_indices = @transform_1, window_bounds = array<i64: 16, 128>}, {transform_indices = @transform_2, window_bounds = array<i64: 1, 3, 128>}]} {
    %c0 = arith.constant 0 : index
    %0 = memref.load %arg1[%c0] : memref<1xf32, #tpu.memory_space<smem>>
    %cst = arith.constant 1.000000e+00 : f32
    %1 = arith.divf %cst, %0 : f32
    %c0_0 = arith.constant 0 : index
    %c0_1 = arith.constant 0 : index
    %2 = vector.load %arg2[%c0_0, %c0_1] : memref<16x128xf32, #tpu.memory_space<vmem>>, vector<16x128xf32>
    %3 = vector.broadcast %1 : f32 to vector<16x128xf32>
    %4 = arith.mulf %2, %3 : vector<16x128xf32>
    %cst_2 = arith.constant -1.600000e+01 : f32
    %cst_3 = arith.constant 1.500000e+01 : f32
    %5 = vector.broadcast %cst_2 : f32 to vector<16x128xf32>
    %6 = arith.maximumf %5, %4 : vector<16x128xf32>
    %7 = vector.broadcast %cst_3 : f32 to vector<16x128xf32>
    %8 = arith.minimumf %7, %6 : vector<16x128xf32>
    %9 = math.roundeven %8 : vector<16x128xf32>
    %10 = vector.broadcast %0 : f32 to vector<16x128xf32>
    %11 = arith.mulf %9, %10 : vector<16x128xf32>
    %c0_4 = arith.constant 0 : index
    %c0_5 = arith.constant 0 : index
    %12 = vector.load %arg3[%c0_4, %c0_5] : memref<16x128xf32, #tpu.memory_space<vmem>>, vector<16x128xf32>
    tpu.vector_store %arg3[%c0_4, %c0_5], %11 {strides = array<i32>} : memref<16x128xf32, #tpu.memory_space<vmem>>, vector<16x128xf32>,
    %13 = arith.subf %2, %11 : vector<16x128xf32>
    %14 = arith.mulf %13, %13 : vector<16x128xf32>
    %cst_6 = arith.constant dense<0.000000e+00> : vector<128xf32>
    %15 = vector.multi_reduction <add>, %14, %cst_6 [0] : vector<16x128xf32> to vector<128xf32>
    %16 = vector.shape_cast %15 : vector<128xf32> to vector<1x128xf32>
    %c0_7 = arith.constant 0 : index
    %c0_8 = arith.constant 0 : index
    %c0_9 = arith.constant 0 : index
    %17 = vector.load %arg4[%c0_7, %c0_8, %c0_9] : memref<1x3x128xf32, #tpu.memory_space<vmem>>, vector<1x1x128xf32>
    %18 = vector.shape_cast %17 : vector<1x1x128xf32> to vector<1x128xf32>
    %19 = vector.shape_cast %16 : vector<1x128xf32> to vector<1x1x128xf32>
    tpu.vector_store %arg4[%c0_7, %c0_8, %c0_9], %19 {strides = array<i32>} : memref<1x3x128xf32, #tpu.memory_space<vmem>>, vector<1x1x128xf32>,
    %cst_10 = arith.constant 2.000000e+00 : f32
    %20 = vector.broadcast %cst_10 : f32 to vector<16x128xf32>
    %21 = arith.mulf %4, %20 : vector<16x128xf32>
    %cst_11 = arith.constant 5.000000e-01 : f32
    %22 = arith.mulf %0, %cst_11 : f32
    %cst_12 = arith.constant -1.600000e+01 : f32
    %cst_13 = arith.constant 1.500000e+01 : f32
    %23 = vector.broadcast %cst_12 : f32 to vector<16x128xf32>
    %24 = arith.maximumf %23, %21 : vector<16x128xf32>
    %25 = vector.broadcast %cst_13 : f32 to vector<16x128xf32>
    %26 = arith.minimumf %25, %24 : vector<16x128xf32>
    %27 = math.roundeven %26 : vector<16x128xf32>
    %28 = vector.broadcast %22 : f32 to vector<16x128xf32>
    %29 = arith.mulf %27, %28 : vector<16x128xf32>
    %30 = arith.subf %2, %29 : vector<16x128xf32>
    %31 = arith.mulf %30, %30 : vector<16x128xf32>
    %cst_14 = arith.constant dense<0.000000e+00> : vector<128xf32>
    %32 = vector.multi_reduction <add>, %31, %cst_14 [0] : vector<16x128xf32> to vector<128xf32>
    %33 = vector.shape_cast %32 : vector<128xf32> to vector<1x128xf32>
    %c0_15 = arith.constant 0 : index
    %c1 = arith.constant 1 : index
    %c0_16 = arith.constant 0 : index
    %34 = vector.load %arg4[%c0_15, %c1, %c0_16] : memref<1x3x128xf32, #tpu.memory_space<vmem>>, vector<1x1x128xf32>
    %35 = vector.shape_cast %34 : vector<1x1x128xf32> to vector<1x128xf32>
    %36 = vector.shape_cast %33 : vector<1x128xf32> to vector<1x1x128xf32>
    tpu.vector_store %arg4[%c0_15, %c1, %c0_16], %36 {strides = array<i32>} : memref<1x3x128xf32, #tpu.memory_space<vmem>>, vector<1x1x128xf32>,
    %cst_17 = arith.constant 5.000000e-01 : f32
    %37 = vector.broadcast %cst_17 : f32 to vector<16x128xf32>
    %38 = arith.mulf %4, %37 : vector<16x128xf32>
    %cst_18 = arith.constant 2.000000e+00 : f32
    %39 = arith.mulf %0, %cst_18 : f32
    %cst_19 = arith.constant -1.600000e+01 : f32
    %cst_20 = arith.constant 1.500000e+01 : f32
    %40 = vector.broadcast %cst_19 : f32 to vector<16x128xf32>
    %41 = arith.maximumf %40, %38 : vector<16x128xf32>
    %42 = vector.broadcast %cst_20 : f32 to vector<16x128xf32>
    %43 = arith.minimumf %42, %41 : vector<16x128xf32>
    %44 = math.roundeven %43 : vector<16x128xf32>
    %45 = vector.broadcast %39 : f32 to vector<16x128xf32>
    %46 = arith.mulf %44, %45 : vector<16x128xf32>
    %47 = arith.subf %2, %46 : vector<16x128xf32>
    %48 = arith.mulf %47, %47 : vector<16x128xf32>
    %cst_21 = arith.constant dense<0.000000e+00> : vector<128xf32>
    %49 = vector.multi_reduction <add>, %48, %cst_21 [0] : vector<16x128xf32> to vector<128xf32>
    %50 = vector.shape_cast %49 : vector<128xf32> to vector<1x128xf32>
    %c0_22 = arith.constant 0 : index
    %c2 = arith.constant 2 : index
    %c0_23 = arith.constant 0 : index
    %51 = vector.load %arg4[%c0_22, %c2, %c0_23] : memref<1x3x128xf32, #tpu.memory_space<vmem>>, vector<1x1x128xf32>
    %52 = vector.shape_cast %51 : vector<1x1x128xf32> to vector<1x128xf32>
    %53 = vector.shape_cast %50 : vector<1x128xf32> to vector<1x1x128xf32>
    tpu.vector_store %arg4[%c0_22, %c2, %c0_23], %53 {strides = array<i32>} : memref<1x3x128xf32, #tpu.memory_space<vmem>>, vector<1x1x128xf32>,
    return
  }
  func.func @transform_0(%arg0: i32, %arg1: memref<1xf32, #tpu.memory_space<smem>>) -> (i32, i32) {
    %c0_i32 = arith.constant 0 : i32
    %c0_i32_0 = arith.constant 0 : i32
    return %arg0, %c0_i32 : i32, i32
  }
  func.func @transform_1(%arg0: i32, %arg1: memref<1xf32, #tpu.memory_space<smem>>) -> (i32, i32) {
    %c0_i32 = arith.constant 0 : i32
    %c0_i32_0 = arith.constant 0 : i32
    return %arg0, %c0_i32 : i32, i32
  }
  func.func @transform_2(%arg0: i32, %arg1: memref<1xf32, #tpu.memory_space<smem>>) -> (i32, i32, i32) {
    %c0_i32 = arith.constant 0 : i32
    %c0_i32_0 = arith.constant 0 : i32
    %c0_i32_1 = arith.constant 0 : i32
    return %arg0, %c0_i32, %c0_i32_0 : i32, i32, i32
  }
}

</mosaic_0001>

<bundles_post_ra>
// kernel: tpu_custom_call.1
= control target key start
LH: loop header
LB: loop body
LE: loop exit
PB: predicated region body
PF: predicated region fallthrough
CT: control target
= control target key end

     0   :  { %10 = vsyncpa [#allocation5], 0  ;;  %s365_s0 = inlined_call_operand.<no memory space> [shape: f32[1], index: 0, kind: input, shape index: {}]   ;;  %s366_s1 = inlined_call_operand.hbm [shape: f32[16,128], index: 1, kind: input, shape index: {}]   ;;  %s367_s2 = inlined_call_operand.hbm [shape: f32[16,128], index: 2, kind: output, shape index: {0}]   ;;  %s368_s3 = inlined_call_operand.vmem [shape: f32[1,3,128], index: 3, kind: output, shape index: {1}]  }
   0x1   :  { %11 = vsyncpa [#allocation6], 0  ;;  %s16_s14 = sshll.u32 %s366_s1, 4  ;;  %s253_s15 = smov [#allocation4]   ;;  %v286_v0 = vstv %s365_s0  ;;  %s17_s14 = int_to_ptr.hbm [resolvable:$true] %s16_s14 }
   0x2   :  { %s18_s16 = sshll.u32 %s253_s15, 4  ;;  %s254_s17 = smov 128   ;;  %s19_s16 = int_to_ptr.vmem [resolvable:$true] %s18_s16 }
   0x3   :  { %s255_s18 = smov 8  }
   0x4   :  { %24 = dma.hbm_to_vmem [thread:$0]  %s17_s14, 256, %s19_s16, [#allocation5], %s254_s17, %s254_s17, %s255_s18  }
   0x5   :  { %249 = dma.done.wait [#allocation5], 256  }
   0x6   :  { %250 = vsyncadd [#allocation5], 4294967040  ;;  %199 = vrcp.f32 %v286_v0  ;;  %v42_v3 = vand.u32 2147483648, %v286_v0  ;;  %vm36_vm0 = vweird.f32 %v286_v0  ;;  %v40_v5 = vand.u32 2147483647, %v286_v0  ;;  %v293_v11 = vld [vmem:[#allocation4] sm:$0xff] }
   0x7   :  { %v295_v12 = vld [vmem:[#allocation4 + $0x8] sm:$0xff]  ;;  %s76_s23 = smul.f32 0.5, %s365_s0  ;;  %s128_s30 = sshll.u32 %s367_s2, 4  ;;  %s129_s30 = int_to_ptr.hbm [resolvable:$true] %s128_s30 }
   0x8   :  { %v43_v7 = vor.u32 1.1754944e-38, %v42_v3  ;;  %vm41_vm3 = vcmp.eq.f32.partialorder %v40_v5, 8.507059e+37  ;;  %s100_s26 = smul.f32 2.0, %s365_s0  ;;  %s256_s0 = smov [#allocation7]  }
   0x9   :  { %v83_v30 = vstv %s76_s23  ;;  %s332_s27 = sshll.u32 %s256_s0, 4  ;;  %s127_s27 = int_to_ptr.vmem [resolvable:$true] %s332_s27 }
   0xa   :  { %v311_v34 = vstv %s100_s26 }
   0xc   :  { %v200_v1 = vpop.eup %199 }
   0xd   :  { %v32_v2 = vmul.f32 %v200_v1, %v286_v0  ;;  %vm37_vm1 = vweird.f32 %v200_v1 }
   0xe   :  { %vm38_vm2 = vmor %vm36_vm0, %vm37_vm1 }
   0xf   :  { %v33_v4 = vsub.f32 1.0, %v32_v2 }
  0x11   :  { %v34_v6 = vmul.f32 %v200_v1, %v33_v4 }
  0x13   :  { %v35_v8 = vadd.f32 %v200_v1, %v34_v6 }
  0x15   :  { %v39_v9 = vsel %vm38_vm2, %v200_v1, %v35_v8 }
  0x16   :  { %v44_v10 = vsel %vm41_vm3, %v43_v7, %v39_v9 }
  0x17   :  { %145 = vpush %v44_v10 }
  0x48   :  { %s146_s1 = spop %145 }
  0x49   :  { %v48_v13 = vstv %s146_s1 }
  0x4a   :  { %v49_v14 = vmul.f32 %v48_v13, %v293_v11  ;;  %v50_v15 = vmul.f32 %v48_v13, %v295_v12 }
  0x4c   :  { %v51_v16 = vmax.f32 %v49_v14, -16.0  ;;  %v52_v17 = vmax.f32 %v50_v15, -16.0  ;;  %v74_v18 = vmul.f32 2.0, %v49_v14  ;;  %v75_v19 = vmul.f32 2.0, %v50_v15 }
  0x4d   :  { %v98_v20 = vmul.f32 0.5, %v49_v14  ;;  %v99_v21 = vmul.f32 0.5, %v50_v15 }
  0x4e   :  { %v305_v22 = vmin.f32 %v51_v16, 15.0  ;;  %v307_v23 = vmin.f32 %v52_v17, 15.0  ;;  %v77_v24 = vmax.f32 %v74_v18, -16.0  ;;  %v78_v25 = vmax.f32 %v75_v19, -16.0 }
  0x4f   :  { %v101_v26 = vmax.f32 %v98_v20, -16.0  ;;  %v102_v27 = vmax.f32 %v99_v21, -16.0 }
  0x50   :  { %v149_v28 = vcvt.f32.s32 %v305_v22  ;;  %v157_v29 = vcvt.f32.s32 %v307_v23  ;;  %v79_v31 = vmin.f32 %v77_v24, 15.0  ;;  %v80_v32 = vmin.f32 %v78_v25, 15.0 }
  0x51   :  { %v103_v33 = vmin.f32 %v101_v26, 15.0  ;;  %v152_v36 = vand.u32 2147483648, %v305_v22  ;;  %v160_v38 = vand.u32 2147483648, %v307_v23  ;;  %v104_v42 = vmin.f32 %v102_v27, 15.0 }
  0x52   :  { %v150_v35 = vcvt.s32.f32 %v149_v28  ;;  %v158_v37 = vcvt.s32.f32 %v157_v29  ;;  %v163_v39 = vand.u32 2147483647, %v79_v31  ;;  %v165_v40 = vcvt.f32.s32 %v79_v31 }
  0x53   :  { %v171_v41 = vand.u32 2147483647, %v80_v32  ;;  %v168_v43 = vand.u32 2147483648, %v79_v31  ;;  %v173_v44 = vcvt.f32.s32 %v80_v32  ;;  %v147_v45 = vand.u32 2147483647, %v305_v22 }
  0x54   :  { %v155_v46 = vand.u32 2147483647, %v307_v23  ;;  %v151_v47 = vand.u32 2147483647, %v150_v35  ;;  %v159_v48 = vand.u32 2147483647, %v158_v37  ;;  %v166_v49 = vcvt.s32.f32 %v165_v40 }
  0x55   :  { %v179_v50 = vand.u32 2147483647, %v103_v33  ;;  %vm317_vm4 = vcmp.lt.f32.partialorder %v163_v39, 8388608.0  ;;  %v174_v52 = vcvt.s32.f32 %v173_v44  ;;  %v176_v53 = vand.u32 2147483648, %v80_v32 }
  0x56   :  { %v181_v54 = vcvt.f32.s32 %v103_v33  ;;  %v167_v55 = vand.u32 2147483647, %v166_v49  ;;  %vm321_vm5 = vcmp.lt.f32.partialorder %v171_v41, 8388608.0  ;;  %v184_v57 = vand.u32 2147483648, %v103_v33 }
  0x57   :  { %v189_v58 = vcvt.f32.s32 %v104_v42  ;;  %v175_v59 = vand.u32 2147483647, %v174_v52  ;;  %vm325_vm6 = vcmp.lt.f32.partialorder %v179_v50, 8388608.0  ;;  %v187_v62 = vand.u32 2147483647, %v104_v42 }
  0x58   :  { %v182_v61 = vcvt.s32.f32 %v181_v54  ;;  %v169_v63 = vor.u32 %v168_v43, %v167_v55  ;;  %v192_v2 = vand.u32 2147483648, %v104_v42  ;;  %v153_v3 = vor.u32 %v152_v36, %v151_v47 }
  0x59   :  { %v190_v1 = vcvt.s32.f32 %v189_v58  ;;  %v177_v4 = vor.u32 %v176_v53, %v175_v59  ;;  %vm148_vm7 = vcmp.lt.f32.partialorder %v147_v45, 8388608.0  ;;  %v161_v6 = vor.u32 %v160_v38, %v159_v48 }
  0x5a   :  { %v183_v5 = vand.u32 2147483647, %v182_v61  ;;  %v170_v7 = vsel %vm317_vm4, %v169_v63, %v79_v31  ;;  %v154_v9 = vsel %vm148_vm7, %v153_v3, %v305_v22  ;;  %vm156_vm8 = vcmp.lt.f32.partialorder %v155_v46, 8388608.0 }
  0x5b   :  { %v191_v8 = vand.u32 2147483647, %v190_v1  ;;  %v178_v10 = vsel %vm321_vm5, %v177_v4, %v80_v32  ;;  %v84_v13 = vmul.f32 %v170_v7, %v83_v30  ;;  %v162_v15 = vsel %vm156_vm8, %v161_v6, %v307_v23 }
  0x5c   :  { %v185_v14 = vor.u32 %v184_v57, %v183_v5  ;;  %v85_v16 = vmul.f32 %v178_v10, %v83_v30  ;;  %v58_v18 = vmul.f32 %v154_v9, %v286_v0  ;;  %v59_v19 = vmul.f32 %v162_v15, %v286_v0 }
  0x5d   :  { %v193_v17 = vor.u32 %v192_v2, %v191_v8  ;;  %v86_v20 = vsub.f32 %v293_v11, %v84_v13  ;;  %vm188_vm9 = vcmp.lt.f32.partialorder %v187_v62, 8388608.0 }
  0x5e   :  { %v186_v21 = vsel %vm325_vm6, %v185_v14, %v103_v33  ;;  %v87_v22 = vsub.f32 %v295_v12, %v85_v16  ;;  %60 = vst [vmem:[#allocation7] sm:$0xff] %v58_v18  ;;  %v62_v23 = vsub.f32 %v293_v11, %v58_v18  ;;  %v63_v0 = vsub.f32 %v295_v12, %v59_v19 }
  0x5f   :  { %v194_v24 = vsel %vm188_vm9, %v193_v17, %v104_v42  ;;  %v108_v25 = vmul.f32 %v186_v21, %v311_v34  ;;  %v88_v26 = vmul.f32 %v86_v20, %v86_v20  ;;  %61 = vst [vmem:[#allocation7 + $0x8] sm:$0xff] %v59_v19 }
  0x60   :  { %v109_v27 = vmul.f32 %v194_v24, %v311_v34  ;;  %v89_v28 = vmul.f32 %v87_v22, %v87_v22  ;;  %v64_v30 = vmul.f32 %v62_v23, %v62_v23  ;;  %134 = dma.vmem_to_hbm [thread:$0]  %s127_s27, 256, %s129_s30, [#allocation6], %s254_s17, %s254_s17, %s255_s18   ;;  %v65_v32 = vmul.f32 %v63_v0, %v63_v0 }
  0x61   :  { %v110_v29 = vsub.f32 %v293_v11, %v108_v25 }
  0x62   :  { %v111_v31 = vsub.f32 %v295_v12, %v109_v27  ;;  %v90_v33 = vadd.f32 %v89_v28, %v88_v26  ;;  %v66_v37 = vadd.f32 %v65_v32, %v64_v30 }
  0x63   :  { %v112_v35 = vmul.f32 %v110_v29, %v110_v29 }
  0x64   :  { %v113_v36 = vmul.f32 %v111_v31, %v111_v31  ;;  %v91_v38 = vrot.slane %v90_v33, 4  ;;  %v67_v39 = vrot.slane %v66_v37, 4 }
  0x66   :  { %v114_v34 = vadd.f32 %v113_v36, %v112_v35  ;;  %v92_v40 = vadd.f32 %v91_v38, %v90_v33  ;;  %v68_v42 = vadd.f32 %v67_v39, %v66_v37 }
  0x68   :  { %v115_v41 = vrot.slane %v114_v34, 4  ;;  %v93_v43 = vrot.slane %v92_v40, 2  ;;  %v69_v44 = vrot.slane %v68_v42, 2 }
  0x6a   :  { %v116_v11 = vadd.f32 %v115_v41, %v114_v34  ;;  %v94_v45 = vadd.f32 %v93_v43, %v92_v40  ;;  %v70_v47 = vadd.f32 %v69_v44, %v68_v42 }
  0x6c   :  { %v117_v46 = vrot.slane %v116_v11, 2  ;;  %v95_v48 = vrot.slane %v94_v45, 1  ;;  %v71_v12 = vrot.slane %v70_v47, 1 }
  0x6e   :  { %v118_v49 = vadd.f32 %v117_v46, %v116_v11  ;;  %v96_v50 = vadd.f32 %v95_v48, %v94_v45  ;;  %v72_v52 = vadd.f32 %v71_v12, %v70_v47 }
  0x70   :  { %v119_v51 = vrot.slane %v118_v49, 1  ;;  %97 = vst [vmem:[%s368_s3 + $0x1] sm:$0x1] %v96_v50 }
  0x71   :  { %73 = vst [vmem:[%s368_s3] sm:$0x1] %v72_v52 }
  0x72   :  { %v120_v53 = vadd.f32 %v119_v51, %v118_v49 }
  0x74   :  { %121 = vst [vmem:[%s368_s3 + $0x2] sm:$0x1] %v120_v53 }
  0x75   :  { %251 = dma.done.wait [#allocation6], 256  }
  0x76   :  { %252 = vsyncadd [#allocation6], 4294967040 }
  0x77   :  { %143 = vsyncpa [#allocation5], 1 }
  0x78   :  { %144 = vsyncpa [#allocation6], 1 }

</bundles_post_ra>
